<compile_context>
chip_gen: v7x
topology: tpu7x:2x2x1
jax: 0.10.0
libtpu: 0.0.40
codegen_flags: <defaults>
</compile_context>

<pallas_src>
import jax
import jax.numpy as jnp
from jax import lax
from jax.experimental import pallas as pl
from jax.experimental.pallas import tpu as pltpu


def _round_up(x, m):
    return ((x + m - 1) // m) * m


def _make_kernel(S, H, G, Xpad, r_whh, r_b, r_w2, r_b2):
    """Build the single-invocation LSTM kernel with static shape parameters."""

    def kernel(x_ref, slab_ref, out_ref, h_scratch):
        # ---- Carve the packed constant slab with static slices (free) -------
        w_x = slab_ref[0:Xpad, 0:G]            # (Xpad, 4H) w_ih^T, zero-padded rows
        whh = slab_ref[r_whh:r_whh + H, 0:G]   # (H, 4H)    w_hh^T
        b   = slab_ref[r_b:r_b + 1, 0:G]       # (1, 4H)    b_ih + b_hh
        w2  = slab_ref[r_w2:r_w2 + H, :]       # (H, W)     linear weight^T, lane-padded
        b2  = slab_ref[r_b2:r_b2 + 1, :]       # (1, W)     linear bias, lane-padded

        # ---- Fused input projection for all timesteps: one MXU pass ---------
        # concat([seq, feat]) is fused away: x is lane-padded with zeros and
        # the padded weight rows are zero, so the product is exact.
        gx = jnp.dot(x_ref[...], w_x, preferred_element_type=jnp.float32) + b

        # ---- LSTM recurrence, fully unrolled; h/c live in vregs -------------
        h = jnp.zeros((1, H), jnp.float32)
        c = jnp.zeros((1, H), jnp.float32)
        for t in range(S):  # S is static & small -> full unroll for LLO visibility
            gates = gx[t:t + 1, :] + jnp.dot(
                h, whh, preferred_element_type=jnp.float32
            )                                          # (1, 4H)
            th = jnp.tanh(gates)                       # one full-width EUP pass
            sg = 0.5 * jnp.tanh(0.5 * gates) + 0.5     # sigmoid: 1 EUP + 2 VPU ops
            i_g = sg[:, 0 * H:1 * H]
            f_g = sg[:, 1 * H:2 * H]
            g_g = th[:, 2 * H:3 * H]
            o_g = sg[:, 3 * H:4 * H]
            c = f_g * c + i_g * g_g
            h = o_g * jnp.tanh(c)
            # Row store to VMEM scratch: uses the vst slot and is NOT a
            # dependency of the next timestep (unlike the old where-stack).
            h_scratch[t:t + 1, :] = h

        # ---- Output head: one bulk matmul + one lane-dense (S, W) store -----
        out_ref[...] = (
            jnp.dot(h_scratch[...], w2, preferred_element_type=jnp.float32) + b2
        )

    return kernel


def pack_lstm_params(params, network_size, feat_size):
    """One-time parameter packing (hoisted out of the per-call path).

    Returns a single lane-dense f32 slab holding every constant operand plus a
    dict of static layout dimensions for the kernel builder.
    """
    N, F = network_size, feat_size
    H = params["w_hh"].shape[1]
    G = 4 * H
    Xpad = _round_up(N + F, 128)                       # lane width of packed x
    W = max(_round_up(G, 128), _round_up(N, 128))      # slab / output lane width
    Hp = _round_up(H, 8)

    r_whh = Xpad                                       # all section starts are
    r_b = r_whh + Hp                                   # multiples of 8 sublanes
    r_w2 = r_b + 8
    r_b2 = r_w2 + Hp
    R = _round_up(r_b2 + 8, 8)

    slab = jnp.zeros((R, W), jnp.float32)
    w_ih_t = params["w_ih"].T.astype(jnp.float32)      # (N+F, 4H)
    slab = slab.at[0:N + F, 0:G].set(w_ih_t)
    slab = slab.at[r_whh:r_whh + H, 0:G].set(params["w_hh"].T.astype(jnp.float32))
    slab = slab.at[r_b:r_b + 1, 0:G].set(
        (params["b_ih"] + params["b_hh"]).reshape(1, G).astype(jnp.float32))
    slab = slab.at[r_w2:r_w2 + H, 0:N].set(params["w2"].T.astype(jnp.float32))
    slab = slab.at[r_b2:r_b2 + 1, 0:N].set(
        params["b2"].reshape(1, N).astype(jnp.float32))

    dims = dict(N=N, F=F, H=H, G=G, Xpad=Xpad, W=W,
                r_whh=r_whh, r_b=r_b, r_w2=r_w2, r_b2=r_b2)
    return jax.device_put(slab), dims


def make_lstm_forward(dims):
    """Returns a jitted forward(input_seq, feat, slab) -> (S, N) predictions."""
    N, F, H, G = dims["N"], dims["F"], dims["H"], dims["G"]
    Xpad, W = dims["Xpad"], dims["W"]
    r_whh, r_b, r_w2, r_b2 = dims["r_whh"], dims["r_b"], dims["r_w2"], dims["r_b2"]

    @jax.jit
    def forward(input_seq, feat, slab):
        S = input_seq.shape[0]
        # Merge seq + feat into ONE lane-padded operand -> single input DMA;
        # fuses the PyTorch concat.
        x_pad = jnp.zeros((S, Xpad), jnp.float32)
        x_pad = x_pad.at[:, 0:N].set(input_seq.astype(jnp.float32))
        x_pad = x_pad.at[:, N:N + F].set(feat.astype(jnp.float32))

        kernel = _make_kernel(S, H, G, Xpad, r_whh, r_b, r_w2, r_b2)
        vmem = pl.BlockSpec(memory_space=pltpu.MemorySpace.VMEM)
        out_pad = pl.pallas_call(
            kernel,
            out_shape=jax.ShapeDtypeStruct((S, W), jnp.float32),
            in_specs=[vmem, vmem],
            out_specs=vmem,
            scratch_shapes=[pltpu.VMEM((S, H), jnp.float32)],
        )(x_pad, slab)
        # TODO(synk): multi-layer LSTM stacking (lstm_layers > 1) not implemented;
        # the module's default (and this config) is a single layer.
        return out_pad[:, :N]

    return forward


def reference_forward(input_seq, feat, params):
    """Pure-JAX reference mirroring the PyTorch forward, for validation."""
    H = params["w_hh"].shape[1]
    x = jnp.concatenate([input_seq, feat], axis=1)
    gx = x @ params["w_ih"].T + params["b_ih"] + params["b_hh"]

    def step(carry, g_t):
        h, c = carry
        gates = g_t + h @ params["w_hh"].T
        i = jax.nn.sigmoid(gates[0 * H:1 * H])
        f = jax.nn.sigmoid(gates[1 * H:2 * H])
        g = jnp.tanh(gates[2 * H:3 * H])
        o = jax.nn.sigmoid(gates[3 * H:4 * H])
        c_new = f * c + i * g
        h_new = o * jnp.tanh(c_new)
        return (h_new, c_new), h_new

    (_, _), h_all = lax.scan(step, (jnp.zeros(H), jnp.zeros(H)), gx)
    return h_all @ params["w2"].T + params["b2"]


if __name__ == "__main__":
    # Small shapes consistent with the module:
    #   feat_size=1, network_size=4, hidden_layer_size=32, lstm_layers=1, seq=8
    S, N, F, H = 8, 4, 1, 32

    key = jax.random.PRNGKey(0)
    ks = jax.random.split(key, 8)
    scale = 1.0 / jnp.sqrt(H)

    params = {
        "w_ih": jax.random.uniform(ks[0], (4 * H, N + F), jnp.float32, -scale, scale),
        "w_hh": jax.random.uniform(ks[1], (4 * H, H), jnp.float32, -scale, scale),
        "b_ih": jax.random.uniform(ks[2], (4 * H,), jnp.float32, -scale, scale),
        "b_hh": jax.random.uniform(ks[3], (4 * H,), jnp.float32, -scale, scale),
        "w2": jax.random.uniform(ks[4], (N, H), jnp.float32, -scale, scale),
        "b2": jax.random.uniform(ks[5], (N,), jnp.float32, -scale, scale),
    }

    input_seq = jax.random.normal(ks[6], (S, N), jnp.float32)
    feat = jax.random.normal(ks[7], (S, F), jnp.float32)

    # One-time parameter packing (hoisted out of the per-call path).
    slab, dims = pack_lstm_params(params, network_size=N, feat_size=F)
    lstm_forward = make_lstm_forward(dims)

    out = lstm_forward(input_seq, feat, slab)
    out = jax.block_until_ready(out)

    ref = reference_forward(input_seq, feat, params)
    assert out.shape == (S, N)
    assert jnp.allclose(out, ref, atol=1e-4, rtol=1e-4), "mismatch vs JAX reference"

    print("KERNEL_OK")
</pallas_src>

<mosaic_0001>
module attributes {stable_mosaic.version = 11 : i64} {
  func.func @kernel(%arg0: memref<8x128xf32, #tpu.memory_space<vmem>>, %arg1: memref<208x128xf32, #tpu.memory_space<vmem>>, %arg2: memref<8x128xf32, #tpu.memory_space<vmem>>, %arg3: memref<8x32xf32, #tpu.memory_space<vmem>>) attributes {dimension_semantics = [], scalar_prefetch = 0 : i64, scratch_operands = 1 : i64, tpu.core_type = #tpu.core_type<tc>} {
    %c0 = arith.constant 0 : index
    %c0_0 = arith.constant 0 : index
    %0 = vector.load %arg1[%c0, %c0_0] : memref<208x128xf32, #tpu.memory_space<vmem>>, vector<128x128xf32>
    %c128 = arith.constant 128 : index
    %c0_1 = arith.constant 0 : index
    %1 = vector.load %arg1[%c128, %c0_1] : memref<208x128xf32, #tpu.memory_space<vmem>>, vector<32x128xf32>
    %c160 = arith.constant 160 : index
    %c0_2 = arith.constant 0 : index
    %2 = vector.load %arg1[%c160, %c0_2] : memref<208x128xf32, #tpu.memory_space<vmem>>, vector<1x128xf32>
    %c168 = arith.constant 168 : index
    %c0_3 = arith.constant 0 : index
    %3 = vector.load %arg1[%c168, %c0_3] : memref<208x128xf32, #tpu.memory_space<vmem>>, vector<32x128xf32>
    %c200 = arith.constant 200 : index
    %c0_4 = arith.constant 0 : index
    %4 = vector.load %arg1[%c200, %c0_4] : memref<208x128xf32, #tpu.memory_space<vmem>>, vector<1x128xf32>
    %c0_5 = arith.constant 0 : index
    %c0_6 = arith.constant 0 : index
    %5 = vector.load %arg0[%c0_5, %c0_6] : memref<8x128xf32, #tpu.memory_space<vmem>>, vector<8x128xf32>
    %cst = arith.constant dense<0.000000e+00> : vector<8x128xf32>
    %6 = tpu.matmul %5, %0, %cst {dimension_numbers = #tpu.dot_dimension_numbers<[1], [0], [0], [1], [0, 0, 1, 1], [], []>} : vector<8x128xf32>, vector<128x128xf32>, vector<8x128xf32> -> vector<8x128xf32>
    %7 = vector.broadcast %2 : vector<1x128xf32> to vector<8x128xf32>
    %8 = arith.addf %6, %7 : vector<8x128xf32>
    %cst_7 = arith.constant 0.000000e+00 : f32
    %9 = vector.broadcast %cst_7 : f32 to vector<1x32xf32>
    %cst_8 = arith.constant 0.000000e+00 : f32
    %10 = vector.broadcast %cst_8 : f32 to vector<1x32xf32>
    %11 = vector.extract_strided_slice %8 {offsets = [0, 0], sizes = [1, 128], strides = [1, 1]} : vector<8x128xf32> to vector<1x128xf32>
    %cst_9 = arith.constant dense<0.000000e+00> : vector<1x128xf32>
    %12 = tpu.matmul %9, %1, %cst_9 {dimension_numbers = #tpu.dot_dimension_numbers<[1], [0], [0], [1], [0, 0, 1, 1], [], []>} : vector<1x32xf32>, vector<32x128xf32>, vector<1x128xf32> -> vector<1x128xf32>
    %13 = arith.addf %11, %12 : vector<1x128xf32>
    %14 = math.tanh %13 : vector<1x128xf32>
    %cst_10 = arith.constant 5.000000e-01 : f32
    %15 = vector.broadcast %cst_10 : f32 to vector<1x128xf32>
    %16 = arith.mulf %15, %13 : vector<1x128xf32>
    %17 = math.tanh %16 : vector<1x128xf32>
    %cst_11 = arith.constant 5.000000e-01 : f32
    %18 = vector.broadcast %cst_11 : f32 to vector<1x128xf32>
    %19 = arith.mulf %18, %17 : vector<1x128xf32>
    %cst_12 = arith.constant 5.000000e-01 : f32
    %20 = vector.broadcast %cst_12 : f32 to vector<1x128xf32>
    %21 = arith.addf %19, %20 : vector<1x128xf32>
    %22 = vector.extract_strided_slice %21 {offsets = [0, 0], sizes = [1, 32], strides = [1, 1]} : vector<1x128xf32> to vector<1x32xf32>
    %23 = vector.extract_strided_slice %21 {offsets = [0, 32], sizes = [1, 32], strides = [1, 1]} : vector<1x128xf32> to vector<1x32xf32>
    %24 = vector.extract_strided_slice %14 {offsets = [0, 64], sizes = [1, 32], strides = [1, 1]} : vector<1x128xf32> to vector<1x32xf32>
    %25 = vector.extract_strided_slice %21 {offsets = [0, 96], sizes = [1, 32], strides = [1, 1]} : vector<1x128xf32> to vector<1x32xf32>
    %26 = arith.mulf %23, %10 : vector<1x32xf32>
    %27 = arith.mulf %22, %24 : vector<1x32xf32>
    %28 = arith.addf %26, %27 : vector<1x32xf32>
    %29 = math.tanh %28 : vector<1x32xf32>
    %30 = arith.mulf %25, %29 : vector<1x32xf32>
    %c0_13 = arith.constant 0 : index
    %c0_14 = arith.constant 0 : index
    %31 = vector.load %arg3[%c0_13, %c0_14] : memref<8x32xf32, #tpu.memory_space<vmem>>, vector<1x32xf32>
    tpu.vector_store %arg3[%c0_13, %c0_14], %30 {strides = array<i32>} : memref<8x32xf32, #tpu.memory_space<vmem>>, vector<1x32xf32>,
    %32 = vector.extract_strided_slice %8 {offsets = [1, 0], sizes = [1, 128], strides = [1, 1]} : vector<8x128xf32> to vector<1x128xf32>
    %cst_15 = arith.constant dense<0.000000e+00> : vector<1x128xf32>
    %33 = tpu.matmul %30, %1, %cst_15 {dimension_numbers = #tpu.dot_dimension_numbers<[1], [0], [0], [1], [0, 0, 1, 1], [], []>} : vector<1x32xf32>, vector<32x128xf32>, vector<1x128xf32> -> vector<1x128xf32>
    %34 = arith.addf %32, %33 : vector<1x128xf32>
    %35 = math.tanh %34 : vector<1x128xf32>
    %cst_16 = arith.constant 5.000000e-01 : f32
    %36 = vector.broadcast %cst_16 : f32 to vector<1x128xf32>
    %37 = arith.mulf %36, %34 : vector<1x128xf32>
    %38 = math.tanh %37 : vector<1x128xf32>
    %cst_17 = arith.constant 5.000000e-01 : f32
    %39 = vector.broadcast %cst_17 : f32 to vector<1x128xf32>
    %40 = arith.mulf %39, %38 : vector<1x128xf32>
    %cst_18 = arith.constant 5.000000e-01 : f32
    %41 = vector.broadcast %cst_18 : f32 to vector<1x128xf32>
    %42 = arith.addf %40, %41 : vector<1x128xf32>
    %43 = vector.extract_strided_slice %42 {offsets = [0, 0], sizes = [1, 32], strides = [1, 1]} : vector<1x128xf32> to vector<1x32xf32>
    %44 = vector.extract_strided_slice %42 {offsets = [0, 32], sizes = [1, 32], strides = [1, 1]} : vector<1x128xf32> to vector<1x32xf32>
    %45 = vector.extract_strided_slice %35 {offsets = [0, 64], sizes = [1, 32], strides = [1, 1]} : vector<1x128xf32> to vector<1x32xf32>
    %46 = vector.extract_strided_slice %42 {offsets = [0, 96], sizes = [1, 32], strides = [1, 1]} : vector<1x128xf32> to vector<1x32xf32>
    %47 = arith.mulf %44, %28 : vector<1x32xf32>
    %48 = arith.mulf %43, %45 : vector<1x32xf32>
    %49 = arith.addf %47, %48 : vector<1x32xf32>
    %50 = math.tanh %49 : vector<1x32xf32>
    %51 = arith.mulf %46, %50 : vector<1x32xf32>
    %c1 = arith.constant 1 : index
    %c0_19 = arith.constant 0 : index
    %52 = vector.load %arg3[%c1, %c0_19] : memref<8x32xf32, #tpu.memory_space<vmem>>, vector<1x32xf32>
    tpu.vector_store %arg3[%c1, %c0_19], %51 {strides = array<i32>} : memref<8x32xf32, #tpu.memory_space<vmem>>, vector<1x32xf32>,
    %53 = vector.extract_strided_slice %8 {offsets = [2, 0], sizes = [1, 128], strides = [1, 1]} : vector<8x128xf32> to vector<1x128xf32>
    %cst_20 = arith.constant dense<0.000000e+00> : vector<1x128xf32>
    %54 = tpu.matmul %51, %1, %cst_20 {dimension_numbers = #tpu.dot_dimension_numbers<[1], [0], [0], [1], [0, 0, 1, 1], [], []>} : vector<1x32xf32>, vector<32x128xf32>, vector<1x128xf32> -> vector<1x128xf32>
    %55 = arith.addf %53, %54 : vector<1x128xf32>
    %56 = math.tanh %55 : vector<1x128xf32>
    %cst_21 = arith.constant 5.000000e-01 : f32
    %57 = vector.broadcast %cst_21 : f32 to vector<1x128xf32>
    %58 = arith.mulf %57, %55 : vector<1x128xf32>
    %59 = math.tanh %58 : vector<1x128xf32>
    %cst_22 = arith.constant 5.000000e-01 : f32
    %60 = vector.broadcast %cst_22 : f32 to vector<1x128xf32>
    %61 = arith.mulf %60, %59 : vector<1x128xf32>
    %cst_23 = arith.constant 5.000000e-01 : f32
    %62 = vector.broadcast %cst_23 : f32 to vector<1x128xf32>
    %63 = arith.addf %61, %62 : vector<1x128xf32>
    %64 = vector.extract_strided_slice %63 {offsets = [0, 0], sizes = [1, 32], strides = [1, 1]} : vector<1x128xf32> to vector<1x32xf32>
    %65 = vector.extract_strided_slice %63 {offsets = [0, 32], sizes = [1, 32], strides = [1, 1]} : vector<1x128xf32> to vector<1x32xf32>
    %66 = vector.extract_strided_slice %56 {offsets = [0, 64], sizes = [1, 32], strides = [1, 1]} : vector<1x128xf32> to vector<1x32xf32>
    %67 = vector.extract_strided_slice %63 {offsets = [0, 96], sizes = [1, 32], strides = [1, 1]} : vector<1x128xf32> to vector<1x32xf32>
    %68 = arith.mulf %65, %49 : vector<1x32xf32>
    %69 = arith.mulf %64, %66 : vector<1x32xf32>
    %70 = arith.addf %68, %69 : vector<1x32xf32>
    %71 = math.tanh %70 : vector<1x32xf32>
    %72 = arith.mulf %67, %71 : vector<1x32xf32>
    %c2 = arith.constant 2 : index
    %c0_24 = arith.constant 0 : index
    %73 = vector.load %arg3[%c2, %c0_24] : memref<8x32xf32, #tpu.memory_space<vmem>>, vector<1x32xf32>
    tpu.vector_store %arg3[%c2, %c0_24], %72 {strides = array<i32>} : memref<8x32xf32, #tpu.memory_space<vmem>>, vector<1x32xf32>,
    %74 = vector.extract_strided_slice %8 {offsets = [3, 0], sizes = [1, 128], strides = [1, 1]} : vector<8x128xf32> to vector<1x128xf32>
    %cst_25 = arith.constant dense<0.000000e+00> : vector<1x128xf32>
    %75 = tpu.matmul %72, %1, %cst_25 {dimension_numbers = #tpu.dot_dimension_numbers<[1], [0], [0], [1], [0, 0, 1, 1], [], []>} : vector<1x32xf32>, vector<32x128xf32>, vector<1x128xf32> -> vector<1x128xf32>
    %76 = arith.addf %74, %75 : vector<1x128xf32>
    %77 = math.tanh %76 : vector<1x128xf32>
    %cst_26 = arith.constant 5.000000e-01 : f32
    %78 = vector.broadcast %cst_26 : f32 to vector<1x128xf32>
    %79 = arith.mulf %78, %76 : vector<1x128xf32>
    %80 = math.tanh %79 : vector<1x128xf32>
    %cst_27 = arith.constant 5.000000e-01 : f32
    %81 = vector.broadcast %cst_27 : f32 to vector<1x128xf32>
    %82 = arith.mulf %81, %80 : vector<1x128xf32>
    %cst_28 = arith.constant 5.000000e-01 : f32
    %83 = vector.broadcast %cst_28 : f32 to vector<1x128xf32>
    %84 = arith.addf %82, %83 : vector<1x128xf32>
    %85 = vector.extract_strided_slice %84 {offsets = [0, 0], sizes = [1, 32], strides = [1, 1]} : vector<1x128xf32> to vector<1x32xf32>
    %86 = vector.extract_strided_slice %84 {offsets = [0, 32], sizes = [1, 32], strides = [1, 1]} : vector<1x128xf32> to vector<1x32xf32>
    %87 = vector.extract_strided_slice %77 {offsets = [0, 64], sizes = [1, 32], strides = [1, 1]} : vector<1x128xf32> to vector<1x32xf32>
    %88 = vector.extract_strided_slice %84 {offsets = [0, 96], sizes = [1, 32], strides = [1, 1]} : vector<1x128xf32> to vector<1x32xf32>
    %89 = arith.mulf %86, %70 : vector<1x32xf32>
    %90 = arith.mulf %85, %87 : vector<1x32xf32>
    %91 = arith.addf %89, %90 : vector<1x32xf32>
    %92 = math.tanh %91 : vector<1x32xf32>
    %93 = arith.mulf %88, %92 : vector<1x32xf32>
    %c3 = arith.constant 3 : index
    %c0_29 = arith.constant 0 : index
    %94 = vector.load %arg3[%c3, %c0_29] : memref<8x32xf32, #tpu.memory_space<vmem>>, vector<1x32xf32>
    tpu.vector_store %arg3[%c3, %c0_29], %93 {strides = array<i32>} : memref<8x32xf32, #tpu.memory_space<vmem>>, vector<1x32xf32>,
    %95 = vector.extract_strided_slice %8 {offsets = [4, 0], sizes = [1, 128], strides = [1, 1]} : vector<8x128xf32> to vector<1x128xf32>
    %cst_30 = arith.constant dense<0.000000e+00> : vector<1x128xf32>
    %96 = tpu.matmul %93, %1, %cst_30 {dimension_numbers = #tpu.dot_dimension_numbers<[1], [0], [0], [1], [0, 0, 1, 1], [], []>} : vector<1x32xf32>, vector<32x128xf32>, vector<1x128xf32> -> vector<1x128xf32>
    %97 = arith.addf %95, %96 : vector<1x128xf32>
    %98 = math.tanh %97 : vector<1x128xf32>
    %cst_31 = arith.constant 5.000000e-01 : f32
    %99 = vector.broadcast %cst_31 : f32 to vector<1x128xf32>
    %100 = arith.mulf %99, %97 : vector<1x128xf32>
    %101 = math.tanh %100 : vector<1x128xf32>
    %cst_32 = arith.constant 5.000000e-01 : f32
    %102 = vector.broadcast %cst_32 : f32 to vector<1x128xf32>
    %103 = arith.mulf %102, %101 : vector<1x128xf32>
    %cst_33 = arith.constant 5.000000e-01 : f32
    %104 = vector.broadcast %cst_33 : f32 to vector<1x128xf32>
    %105 = arith.addf %103, %104 : vector<1x128xf32>
    %106 = vector.extract_strided_slice %105 {offsets = [0, 0], sizes = [1, 32], strides = [1, 1]} : vector<1x128xf32> to vector<1x32xf32>
    %107 = vector.extract_strided_slice %105 {offsets = [0, 32], sizes = [1, 32], strides = [1, 1]} : vector<1x128xf32> to vector<1x32xf32>
    %108 = vector.extract_strided_slice %98 {offsets = [0, 64], sizes = [1, 32], strides = [1, 1]} : vector<1x128xf32> to vector<1x32xf32>
    %109 = vector.extract_strided_slice %105 {offsets = [0, 96], sizes = [1, 32], strides = [1, 1]} : vector<1x128xf32> to vector<1x32xf32>
    %110 = arith.mulf %107, %91 : vector<1x32xf32>
    %111 = arith.mulf %106, %108 : vector<1x32xf32>
    %112 = arith.addf %110, %111 : vector<1x32xf32>
    %113 = math.tanh %112 : vector<1x32xf32>
    %114 = arith.mulf %109, %113 : vector<1x32xf32>
    %c4 = arith.constant 4 : index
    %c0_34 = arith.constant 0 : index
    %115 = vector.load %arg3[%c4, %c0_34] : memref<8x32xf32, #tpu.memory_space<vmem>>, vector<1x32xf32>
    tpu.vector_store %arg3[%c4, %c0_34], %114 {strides = array<i32>} : memref<8x32xf32, #tpu.memory_space<vmem>>, vector<1x32xf32>,
    %116 = vector.extract_strided_slice %8 {offsets = [5, 0], sizes = [1, 128], strides = [1, 1]} : vector<8x128xf32> to vector<1x128xf32>
    %cst_35 = arith.constant dense<0.000000e+00> : vector<1x128xf32>
    %117 = tpu.matmul %114, %1, %cst_35 {dimension_numbers = #tpu.dot_dimension_numbers<[1], [0], [0], [1], [0, 0, 1, 1], [], []>} : vector<1x32xf32>, vector<32x128xf32>, vector<1x128xf32> -> vector<1x128xf32>
    %118 = arith.addf %116, %117 : vector<1x128xf32>
    %119 = math.tanh %118 : vector<1x128xf32>
    %cst_36 = arith.constant 5.000000e-01 : f32
    %120 = vector.broadcast %cst_36 : f32 to vector<1x128xf32>
    %121 = arith.mulf %120, %118 : vector<1x128xf32>
    %122 = math.tanh %121 : vector<1x128xf32>
    %cst_37 = arith.constant 5.000000e-01 : f32
    %123 = vector.broadcast %cst_37 : f32 to vector<1x128xf32>
    %124 = arith.mulf %123, %122 : vector<1x128xf32>
    %cst_38 = arith.constant 5.000000e-01 : f32
    %125 = vector.broadcast %cst_38 : f32 to vector<1x128xf32>
    %126 = arith.addf %124, %125 : vector<1x128xf32>
    %127 = vector.extract_strided_slice %126 {offsets = [0, 0], sizes = [1, 32], strides = [1, 1]} : vector<1x128xf32> to vector<1x32xf32>
    %128 = vector.extract_strided_slice %126 {offsets = [0, 32], sizes = [1, 32], strides = [1, 1]} : vector<1x128xf32> to vector<1x32xf32>
    %129 = vector.extract_strided_slice %119 {offsets = [0, 64], sizes = [1, 32], strides = [1, 1]} : vector<1x128xf32> to vector<1x32xf32>
    %130 = vector.extract_strided_slice %126 {offsets = [0, 96], sizes = [1, 32], strides = [1, 1]} : vector<1x128xf32> to vector<1x32xf32>
    %131 = arith.mulf %128, %112 : vector<1x32xf32>
    %132 = arith.mulf %127, %129 : vector<1x32xf32>
    %133 = arith.addf %131, %132 : vector<1x32xf32>
    %134 = math.tanh %133 : vector<1x32xf32>
    %135 = arith.mulf %130, %134 : vector<1x32xf32>
    %c5 = arith.constant 5 : index
    %c0_39 = arith.constant 0 : index
    %136 = vector.load %arg3[%c5, %c0_39] : memref<8x32xf32, #tpu.memory_space<vmem>>, vector<1x32xf32>
    tpu.vector_store %arg3[%c5, %c0_39], %135 {strides = array<i32>} : memref<8x32xf32, #tpu.memory_space<vmem>>, vector<1x32xf32>,
    %137 = vector.extract_strided_slice %8 {offsets = [6, 0], sizes = [1, 128], strides = [1, 1]} : vector<8x128xf32> to vector<1x128xf32>
    %cst_40 = arith.constant dense<0.000000e+00> : vector<1x128xf32>
    %138 = tpu.matmul %135, %1, %cst_40 {dimension_numbers = #tpu.dot_dimension_numbers<[1], [0], [0], [1], [0, 0, 1, 1], [], []>} : vector<1x32xf32>, vector<32x128xf32>, vector<1x128xf32> -> vector<1x128xf32>
    %139 = arith.addf %137, %138 : vector<1x128xf32>
    %140 = math.tanh %139 : vector<1x128xf32>
    %cst_41 = arith.constant 5.000000e-01 : f32
    %141 = vector.broadcast %cst_41 : f32 to vector<1x128xf32>
    %142 = arith.mulf %141, %139 : vector<1x128xf32>
    %143 = math.tanh %142 : vector<1x128xf32>
    %cst_42 = arith.constant 5.000000e-01 : f32
    %144 = vector.broadcast %cst_42 : f32 to vector<1x128xf32>
    %145 = arith.mulf %144, %143 : vector<1x128xf32>
    %cst_43 = arith.constant 5.000000e-01 : f32
    %146 = vector.broadcast %cst_43 : f32 to vector<1x128xf32>
    %147 = arith.addf %145, %146 : vector<1x128xf32>
    %148 = vector.extract_strided_slice %147 {offsets = [0, 0], sizes = [1, 32], strides = [1, 1]} : vector<1x128xf32> to vector<1x32xf32>
    %149 = vector.extract_strided_slice %147 {offsets = [0, 32], sizes = [1, 32], strides = [1, 1]} : vector<1x128xf32> to vector<1x32xf32>
    %150 = vector.extract_strided_slice %140 {offsets = [0, 64], sizes = [1, 32], strides = [1, 1]} : vector<1x128xf32> to vector<1x32xf32>
    %151 = vector.extract_strided_slice %147 {offsets = [0, 96], sizes = [1, 32], strides = [1, 1]} : vector<1x128xf32> to vector<1x32xf32>
    %152 = arith.mulf %149, %133 : vector<1x32xf32>
    %153 = arith.mulf %148, %150 : vector<1x32xf32>
    %154 = arith.addf %152, %153 : vector<1x32xf32>
    %155 = math.tanh %154 : vector<1x32xf32>
    %156 = arith.mulf %151, %155 : vector<1x32xf32>
    %c6 = arith.constant 6 : index
    %c0_44 = arith.constant 0 : index
    %157 = vector.load %arg3[%c6, %c0_44] : memref<8x32xf32, #tpu.memory_space<vmem>>, vector<1x32xf32>
    tpu.vector_store %arg3[%c6, %c0_44], %156 {strides = array<i32>} : memref<8x32xf32, #tpu.memory_space<vmem>>, vector<1x32xf32>,
    %158 = vector.extract_strided_slice %8 {offsets = [7, 0], sizes = [1, 128], strides = [1, 1]} : vector<8x128xf32> to vector<1x128xf32>
    %cst_45 = arith.constant dense<0.000000e+00> : vector<1x128xf32>
    %159 = tpu.matmul %156, %1, %cst_45 {dimension_numbers = #tpu.dot_dimension_numbers<[1], [0], [0], [1], [0, 0, 1, 1], [], []>} : vector<1x32xf32>, vector<32x128xf32>, vector<1x128xf32> -> vector<1x128xf32>
    %160 = arith.addf %158, %159 : vector<1x128xf32>
    %161 = math.tanh %160 : vector<1x128xf32>
    %cst_46 = arith.constant 5.000000e-01 : f32
    %162 = vector.broadcast %cst_46 : f32 to vector<1x128xf32>
    %163 = arith.mulf %162, %160 : vector<1x128xf32>
    %164 = math.tanh %163 : vector<1x128xf32>
    %cst_47 = arith.constant 5.000000e-01 : f32
    %165 = vector.broadcast %cst_47 : f32 to vector<1x128xf32>
    %166 = arith.mulf %165, %164 : vector<1x128xf32>
    %cst_48 = arith.constant 5.000000e-01 : f32
    %167 = vector.broadcast %cst_48 : f32 to vector<1x128xf32>
    %168 = arith.addf %166, %167 : vector<1x128xf32>
    %169 = vector.extract_strided_slice %168 {offsets = [0, 0], sizes = [1, 32], strides = [1, 1]} : vector<1x128xf32> to vector<1x32xf32>
    %170 = vector.extract_strided_slice %168 {offsets = [0, 32], sizes = [1, 32], strides = [1, 1]} : vector<1x128xf32> to vector<1x32xf32>
    %171 = vector.extract_strided_slice %161 {offsets = [0, 64], sizes = [1, 32], strides = [1, 1]} : vector<1x128xf32> to vector<1x32xf32>
    %172 = vector.extract_strided_slice %168 {offsets = [0, 96], sizes = [1, 32], strides = [1, 1]} : vector<1x128xf32> to vector<1x32xf32>
    %173 = arith.mulf %170, %154 : vector<1x32xf32>
    %174 = arith.mulf %169, %171 : vector<1x32xf32>
    %175 = arith.addf %173, %174 : vector<1x32xf32>
    %176 = math.tanh %175 : vector<1x32xf32>
    %177 = arith.mulf %172, %176 : vector<1x32xf32>
    %c7 = arith.constant 7 : index
    %c0_49 = arith.constant 0 : index
    %178 = vector.load %arg3[%c7, %c0_49] : memref<8x32xf32, #tpu.memory_space<vmem>>, vector<1x32xf32>
    tpu.vector_store %arg3[%c7, %c0_49], %177 {strides = array<i32>} : memref<8x32xf32, #tpu.memory_space<vmem>>, vector<1x32xf32>,
    %c0_50 = arith.constant 0 : index
    %c0_51 = arith.constant 0 : index
    %179 = vector.load %arg3[%c0_50, %c0_51] : memref<8x32xf32, #tpu.memory_space<vmem>>, vector<8x32xf32>
    %cst_52 = arith.constant dense<0.000000e+00> : vector<8x128xf32>
    %180 = tpu.matmul %179, %3, %cst_52 {dimension_numbers = #tpu.dot_dimension_numbers<[1], [0], [0], [1], [0, 0, 1, 1], [], []>} : vector<8x32xf32>, vector<32x128xf32>, vector<8x128xf32> -> vector<8x128xf32>
    %181 = vector.broadcast %4 : vector<1x128xf32> to vector<8x128xf32>
    %182 = arith.addf %180, %181 : vector<8x128xf32>
    %c0_53 = arith.constant 0 : index
    %c0_54 = arith.constant 0 : index
    %183 = vector.load %arg2[%c0_53, %c0_54] : memref<8x128xf32, #tpu.memory_space<vmem>>, vector<8x128xf32>
    tpu.vector_store %arg2[%c0_53, %c0_54], %182 {strides = array<i32>} : memref<8x128xf32, #tpu.memory_space<vmem>>, vector<8x128xf32>,
    return
  }
}

</mosaic_0001>

<bundles_post_ra>
// kernel: forward.1
= control target key start
LH: loop header
LB: loop body
LE: loop exit
PB: predicated region body
PF: predicated region fallthrough
CT: control target
= control target key end

     0   :  { %7 = vsyncpa [#allocation4], 0  ;;  %s1444_s9 = smov [#allocation3]   ;;  %s1624_s0 = inlined_call_operand.vmem [shape: f32[8,128], index: 0, kind: input, shape index: {}]   ;;  %s1625_s1 = inlined_call_operand.hbm [shape: f32[208,128], index: 1, kind: input, shape index: {}]   ;;  %s1626_s2 = inlined_call_operand.vmem [shape: f32[8,128], index: 2, kind: output, shape index: {}]  }
   0x1   :  { %s15_s10 = sshll.u32 %s1444_s9, 4  ;;  %s1420_s13 = scalar_lea.hbm %s1625_s1, 3328  ;;  %s16_s10 = int_to_ptr.vmem [resolvable:$true] %s15_s10 }
   0x2   :  { %p1421_p0 = scmp.ne.s32.totalorder %s1625_s1, %s1420_s13  ;;  %p1424_p1 = scmp.lt.u32.totalorder %s1420_s13, %s1625_s1 }
   0x4   :  { %p1426_p2 = pnand %p1424_p1, %p1421_p0 }
   0x6   :  { %1429 = shalt.err (!%p1426_p2)
}
   0x7   :  { %s1430_s18 = scalar_lea.vmem %s16_s10, 3328  ;;  %p1435_p4 = scmp.lt.s32.totalorder %s16_s10, %s16_s10 }
   0x8   :  { %p1431_p3 = scmp.ne.s32.totalorder %s16_s10, %s1430_s18  ;;  %p1436_p5 = scmp.lt.s32.totalorder %s1430_s18, %s1430_s18 }
   0xa   :  { %p1437_p6 = por %p1436_p5, %p1435_p4 }
   0xc   :  { %p1438_p7 = pnand %p1437_p6, %p1431_p3 }
   0xe   :  { %1441 = shalt.err (!%p1438_p7)
}
   0xf   :  { %s1445_s19 = smov 128   ;;  %s1446_s20 = smov 8  }
  0x10   :  { %21 = dma.hbm_to_vmem [thread:$0]  %s1625_s1, 3328, %s16_s10, [#allocation4], %s1445_s19, %s1445_s19, %s1446_s20  }
  0x11   :  { %1442 = dma.done.wait [#allocation4], 3328  }
  0x12   :  { %1443 = vsyncadd [#allocation4], 4294963968  ;;  %v1447_v0 = vmov 0.0|0.0   ;;  %vm1448_vm0 = vmmov 0   ;;  %v1449_v1 = vmov 0.0   ;;  %v25_v2 = vld [vmem:[#allocation3] sm:$0xff] }
  0x13   :  { %1286 = vmatprep.subr.bf16.mxu0 %v1447_v0  ;;  %1310 = vmatprep.subr.bf16.mxu1 %v1447_v0  ;;  %v26_v3 = vld [vmem:[#allocation3 + $0x8] sm:$0xff]  ;;  %v27_v4 = vld [vmem:[#allocation3 + $0x10] sm:$0xff]  ;;  %v28_v6 = vld [vmem:[#allocation3 + $0x18] sm:$0xff]  ;;  %s1451_s24 = smov 32   ;;  %vm227_vm1 = vcmask 253952   ;;  %vm126_vm2 = vcmask 261120  }
  0x14   :  { %1184 = vmatprep.mubr.msk.f32.mxu0 %vm1448_vm0, %v1449_v1  ;;  %1195 = vmatprep.mubr.msk.f32.mxu1 %vm1448_vm0, %v1449_v1  ;;  %v1287_v5 = vpack.c.bf16 %v26_v3, %v25_v2  ;;  %v1290_v7 = vpack.c.bf16 %v28_v6, %v27_v4  ;;  %v29_v8 = vld [vmem:[#allocation3 + $0x20] sm:$0xff]  ;;  %v30_v9 = vld [vmem:[#allocation3 + $0x28] sm:$0xff]  ;;  %v43_v13 = vld [vmem:[#allocation3 + $0x90] sm:$0xff]  ;;  %vm334_vm3 = vcmask 254977   ;;  %vm554_vm4 = vcmask 257027  }
  0x15   :  { %v41_v10 = vld [vmem:[#allocation3 + $0x80] sm:$0xff]  ;;  %v42_v11 = vld [vmem:[#allocation3 + $0x88] sm:$0xff]  ;;  %v44_v14 = vld [vmem:[#allocation3 + $0x98] sm:$0xff]  ;;  %v1293_v15 = vpack.c.bf16 %v30_v9, %v29_v8  ;;  %vm774_vm5 = vcmask 259077   ;;  %vm444_vm6 = vcmask 256002   ;;  %vm664_vm7 = vcmask 258052  }
  0x16   :  { %1288 = vmatpush3.bf16.msra.mxu0 %v1287_v5  ;;  %v1486_v12 = vpack.c.bf16 %v42_v11, %v41_v10  ;;  %v31_v16 = vld [vmem:[#allocation3 + $0x30] sm:$0xff]  ;;  %v32_v17 = vld [vmem:[#allocation3 + $0x38] sm:$0xff]  ;;  %v1490_v18 = vpack.c.bf16 %v44_v14, %v43_v13  ;;  %v33_v20 = vld [vmem:[#allocation3 + $0x40] sm:$0xff]  ;;  %vm884_vm8 = vcmask 260102   ;;  %vm994_vm9 = vcmask 261127  }
  0x17   :  { %1289 = vmatprep.subr.bf16.mxu0 %v1447_v0  ;;  %v1296_v19 = vpack.c.bf16 %v32_v17, %v31_v16  ;;  %v34_v21 = vld [vmem:[#allocation3 + $0x48] sm:$0xff]  ;;  %v35_v23 = vld [vmem:[#allocation3 + $0x50] sm:$0xff]  ;;  %v36_v24 = vld [vmem:[#allocation3 + $0x58] sm:$0xff] }
  0x18   :  { %1312 = vmatpush3.bf16.msra.mxu1 %v1486_v12  ;;  %v1299_v22 = vpack.c.bf16 %v34_v21, %v33_v20  ;;  %v1302_v25 = vpack.c.bf16 %v36_v24, %v35_v23  ;;  %v37_v26 = vld [vmem:[#allocation3 + $0x60] sm:$0xff]  ;;  %v38_v27 = vld [vmem:[#allocation3 + $0x68] sm:$0xff]  ;;  %v39_v29 = vld [vmem:[#allocation3 + $0x70] sm:$0xff] }
  0x19   :  { %1313 = vmatprep.subr.bf16.mxu1 %v1447_v0  ;;  %v1305_v28 = vpack.c.bf16 %v38_v27, %v37_v26  ;;  %v40_v30 = vld [vmem:[#allocation3 + $0x78] sm:$0xff]  ;;  %v1080_v35 = vld [vmem:[#allocation3 + $0xa0] ss:$0 sm:$0xff] }
  0x1a   :  { %1291 = vmatpush3.bf16.msra.mxu0 %v1290_v7  ;;  %v1308_v31 = vpack.c.bf16 %v40_v30, %v39_v29  ;;  %v51_v32 = vld [vmem:[%s1624_s0] sm:$0xff]  ;;  %s1450_s0 = smov 64  }
  0x1b   :  { %1292 = vmatprep.subr.bf16.mxu0 %v1447_v0 }
  0x1c   :  { %1315 = vmatpush3.bf16.msra.mxu1 %v1490_v18 }
  0x1d   :  { %1316 = vmatprep.subr.bf16.mxu1 %v1447_v0 }
  0x1e   :  { %1294 = vmatpush3.bf16.msra.mxu0 %v1293_v15 }
  0x1f   :  { %1295 = vmatprep.subr.bf16.mxu0 %v1447_v0  ;;  %1196 = vmatmul.mubr.f32.vlgmr.msra.gmra.mrb[0].mxu1 %v1449_v1 }
  0x20   :  { %1318 = vmatpush3.bf16.msra.mxu1 %v1486_v12  ;;  %1206 = vmatprep.mubr.msk.f32.mxu1 %vm1448_vm0, %v1449_v1 }
  0x21   :  { %1319 = vmatprep.subr.bf16.mxu1 %v1447_v0 }
  0x22   :  { %1297 = vmatpush3.bf16.msra.mxu0 %v1296_v19 }
  0x23   :  { %1298 = vmatprep.subr.bf16.mxu0 %v1447_v0 }
  0x24   :  { %1321 = vmatpush3.bf16.msra.mxu1 %v1490_v18 }
  0x25   :  { %1322 = vmatprep.subr.bf16.mxu1 %v1447_v0 }
  0x26   :  { %1300 = vmatpush3.bf16.msra.mxu0 %v1299_v22 }
  0x27   :  { %1301 = vmatprep.subr.bf16.mxu0 %v1447_v0 }
  0x2a   :  { %1303 = vmatpush3.bf16.msra.mxu0 %v1302_v25 }
  0x2b   :  { %1304 = vmatprep.subr.bf16.mxu0 %v1447_v0 }
  0x2e   :  { %1306 = vmatpush3.bf16.msra.mxu0 %v1305_v28 }
  0x2f   :  { %1307 = vmatprep.subr.bf16.mxu0 %v1447_v0 }
  0x32   :  { %1309 = vmatpush3.bf16.msra.mxu0 %v1308_v31 }
  0x33   :  { %1334 = vmatprep.subr.bf16.mxu0 %v1447_v0 }
  0x35   :  { %1185 = vmatmul.mubr.f32.vlgmr.msra.gmra.mrb[0].mxu0 %v51_v32 }
  0x36   :  { %1336 = vmatpush3.bf16.msra.mxu0 %v1486_v12  ;;  %1239 = vmatprep.mubr.msk.f32.mxu0 %vm1448_vm0, %v1449_v1 }
  0x37   :  { %1337 = vmatprep.subr.bf16.mxu0 %v1447_v0 }
  0x3a   :  { %1339 = vmatpush3.bf16.msra.mxu0 %v1490_v18 }
  0x3b   :  { %1346 = vmatprep.subr.bf16.mxu0 %v1447_v0 }
  0xf2   :  { %v196_v33 = vpop.f32.mrb[0].mxu1 }
  0xf3   :  { %v1197_v34 = vpop.f32.mrb[1].mxu1 }
 0x108   :  { %v122_v36 = vpop.f32.mrb[0].mxu0 }
 0x109   :  { %v1517_v37 = vadd.f32 %v1080_v35, %v122_v36  ;;  %v1186_v38 = vpop.f32.mrb[1].mxu0 }
 0x10b   :  { %v200_v39 = vadd.f32 %v196_v33, %v1517_v37 }
 0x10d   :  { %1372 = vtanh.f32 %v200_v39  ;;  %v202_v41 = vmul.f32 0.5, %v200_v39 }
 0x10f   :  { %1374 = vtanh.f32 %v202_v41 }
 0x117   :  { %v1373_v40 = vpop.eup %1372 }
 0x118   :  { %208 = vrot.lane.b32.xlu0 %v1373_v40, %s1450_s0 }
 0x119   :  { %v1375_v42 = vpop.eup %1374 }
 0x11a   :  { %v204_v43 = vmul.f32 0.5, %v1375_v42 }
 0x11c   :  { %v205_v44 = vadd.f32 0.5, %v204_v43 }
 0x11e   :  { %v206_v47 = vmul.f32 0.0, %v205_v44 }
 0x18a   :  { %v209_v45 = vpop.permute.xlu0 %208 }
 0x18b   :  { %v211_v46 = vmul.f32 %v209_v45, %v205_v44 }
 0x18d   :  { %213 = vrot.lane.b32.xlu0 %v211_v46, %s1451_s24 }
 0x1ff   :  { %v214_v48 = vpop.permute.xlu0 %213 }
 0x200   :  { %v216_v49 = vadd.f32 %v214_v48, %v206_v47 }
 0x202   :  { %1376 = vtanh.f32 %v216_v49  ;;  %v311_v3 = vrot.slane %v216_v49, 7 }
 0x20c   :  { %v1377_v50 = vpop.eup %1376 }
 0x20d   :  { %219 = vrot.lane.b32.xlu1 %v1377_v50, %s1450_s0 }
 0x27f   :  { %v220_v51 = vpop.permute.xlu1 %219 }
 0x280   :  { %v222_v52 = vmul.f32 %v220_v51, %v205_v44 }
 0x282   :  { %224 = vrot.lane.b32.xlu1 %v222_v52, %s1451_s24 }
 0x2f4   :  { %v225_v53 = vpop.permute.xlu1 %224 }
 0x2f5   :  { %228 = vst.msk [vmem:[#allocation2] sm:$0x1] %vm227_vm1, %v225_v53  ;;  %1207 = vmatmul.mubr.msk.f32.vlgmr.msra.gmra.mrb[2].mxu1 %vm126_vm2, %v225_v53 }
 0x2f6   :  { %1324 = vmatpush3.bf16.msra.mxu1 %v1486_v12  ;;  %1217 = vmatprep.mubr.msk.f32.mxu1 %vm1448_vm0, %v1449_v1 }
 0x2f7   :  { %1325 = vmatprep.subr.bf16.mxu1 %v1447_v0 }
 0x2fa   :  { %1327 = vmatpush3.bf16.msra.mxu1 %v1490_v18 }
 0x2fb   :  { %1328 = vmatprep.subr.bf16.mxu1 %v1447_v0 }
 0x3c8   :  { %v297_v54 = vpop.f32.mrb[2].mxu1 }
 0x3c9   :  { %v302_v55 = vrot.slane %v297_v54, 7  ;;  %v1208_v56 = vpop.f32.mrb[3].mxu1 }
 0x3cb   :  { %v304_v57 = vadd.f32 %v302_v55, %v1517_v37 }
 0x3cd   :  { %1378 = vtanh.f32 %v304_v57  ;;  %v306_v59 = vmul.f32 0.5, %v304_v57 }
 0x3cf   :  { %1380 = vtanh.f32 %v306_v59 }
 0x3d7   :  { %v1379_v58 = vpop.eup %1378 }
 0x3d8   :  { %315 = vrot.lane.b32.xlu0 %v1379_v58, %s1450_s0 }
 0x3d9   :  { %v1381_v60 = vpop.eup %1380 }
 0x3da   :  { %v308_v61 = vmul.f32 0.5, %v1381_v60 }
 0x3dc   :  { %v309_v62 = vadd.f32 0.5, %v308_v61 }
 0x3de   :  { %v313_v4 = vmul.f32 %v311_v3, %v309_v62 }
 0x44a   :  { %v316_v63 = vpop.permute.xlu0 %315 }
 0x44b   :  { %v318_v2 = vmul.f32 %v316_v63, %v309_v62 }
 0x44d   :  { %320 = vrot.lane.b32.xlu1 %v318_v2, %s1451_s24 }
 0x4bf   :  { %v321_v5 = vpop.permute.xlu1 %320 }
 0x4c0   :  { %v323_v6 = vadd.f32 %v321_v5, %v313_v4 }
 0x4c2   :  { %1382 = vtanh.f32 %v323_v6  ;;  %v421_v25 = vrot.slane %v323_v6, 7 }
 0x4cc   :  { %v1383_v7 = vpop.eup %1382 }
 0x4cd   :  { %326 = vrot.lane.b32.xlu0 %v1383_v7, %s1450_s0 }
 0x53f   :  { %v327_v8 = vpop.permute.xlu0 %326 }
 0x540   :  { %v1535_v9 = vmul.f32 %v327_v8, %v309_v62 }
 0x542   :  { %v336_v10 = vrot.slane %v1535_v9, 1 }
 0x544   :  { %337 = vrot.lane.b32.xlu1 %v336_v10, %s1451_s24 }
 0x5b6   :  { %v338_v11 = vpop.permute.xlu1 %337 }
 0x5b7   :  { %1218 = vmatmul.mubr.msk.f32.vlgmr.msra.gmra.mrb[4].mxu1 %vm126_vm2, %v338_v11 }
 0x5b8   :  { %1330 = vmatpush3.bf16.msra.mxu1 %v1486_v12  ;;  %1228 = vmatprep.mubr.msk.f32.mxu1 %vm1448_vm0, %v1449_v1 }
 0x5b9   :  { %1331 = vmatprep.subr.bf16.mxu1 %v1447_v0 }
 0x5bc   :  { %1333 = vmatpush3.bf16.msra.mxu1 %v1490_v18 }
 0x5bd   :  { %1340 = vmatprep.subr.bf16.mxu1 %v1447_v0 }
 0x68a   :  { %v407_v13 = vpop.f32.mrb[4].mxu1 }
 0x68b   :  { %v412_v14 = vrot.slane %v407_v13, 6  ;;  %v1219_v15 = vpop.f32.mrb[5].mxu1 }
 0x68d   :  { %v414_v16 = vadd.f32 %v412_v14, %v1517_v37 }
 0x68f   :  { %1384 = vtanh.f32 %v414_v16  ;;  %v416_v19 = vmul.f32 0.5, %v414_v16 }
 0x691   :  { %1386 = vtanh.f32 %v416_v19 }
 0x699   :  { %v1385_v17 = vpop.eup %1384 }
 0x69a   :  { %425 = vrot.lane.b32.xlu0 %v1385_v17, %s1450_s0 }
 0x69b   :  { %v1387_v20 = vpop.eup %1386 }
 0x69c   :  { %v418_v21 = vmul.f32 0.5, %v1387_v20 }
 0x69e   :  { %v419_v22 = vadd.f32 0.5, %v418_v21 }
 0x6a0   :  { %v423_v26 = vmul.f32 %v421_v25, %v419_v22 }
 0x70c   :  { %v426_v23 = vpop.permute.xlu0 %425 }
 0x70d   :  { %v428_v24 = vmul.f32 %v426_v23, %v419_v22 }
 0x70f   :  { %430 = vrot.lane.b32.xlu1 %v428_v24, %s1451_s24 }
 0x781   :  { %v431_v27 = vpop.permute.xlu1 %430 }
 0x782   :  { %v433_v28 = vadd.f32 %v431_v27, %v423_v26 }
 0x784   :  { %1388 = vtanh.f32 %v433_v28  ;;  %v531_v46 = vrot.slane %v433_v28, 7 }
 0x78e   :  { %v1389_v29 = vpop.eup %1388 }
 0x78f   :  { %436 = vrot.lane.b32.xlu0 %v1389_v29, %s1450_s0 }
 0x801   :  { %v437_v30 = vpop.permute.xlu0 %436 }
 0x802   :  { %v1550_v31 = vmul.f32 %v437_v30, %v419_v22 }
 0x804   :  { %v446_v32 = vrot.slane %v1550_v31, 2 }
 0x806   :  { %447 = vrot.lane.b32.xlu1 %v446_v32, %s1451_s24 }
 0x878   :  { %v448_v33 = vpop.permute.xlu1 %447 }
 0x879   :  { %1229 = vmatmul.mubr.msk.f32.vlgmr.msra.gmra.mrb[6].mxu1 %vm126_vm2, %v448_v33 }
 0x87a   :  { %1342 = vmatpush3.bf16.msra.mxu1 %v1486_v12  ;;  %1250 = vmatprep.mubr.msk.f32.mxu1 %vm1448_vm0, %v1449_v1 }
 0x87b   :  { %1343 = vmatprep.subr.bf16.mxu1 %v1447_v0 }
 0x87e   :  { %1345 = vmatpush3.bf16.msra.mxu1 %v1490_v18 }
 0x87f   :  { %1352 = vmatprep.subr.bf16.mxu1 %v1447_v0 }
 0x94c   :  { %v517_v34 = vpop.f32.mrb[6].mxu1 }
 0x94d   :  { %v522_v35 = vrot.slane %v517_v34, 5  ;;  %v1230_v36 = vpop.f32.mrb[7].mxu1 }
 0x94f   :  { %v524_v38 = vadd.f32 %v522_v35, %v1517_v37 }
 0x951   :  { %1390 = vtanh.f32 %v524_v38  ;;  %v526_v40 = vmul.f32 0.5, %v524_v38 }
 0x953   :  { %1392 = vtanh.f32 %v526_v40 }
 0x95b   :  { %v1391_v39 = vpop.eup %1390 }
 0x95c   :  { %535 = vrot.lane.b32.xlu0 %v1391_v39, %s1450_s0 }
 0x95d   :  { %v1393_v41 = vpop.eup %1392 }
 0x95e   :  { %v528_v42 = vmul.f32 0.5, %v1393_v41 }
 0x960   :  { %v529_v43 = vadd.f32 0.5, %v528_v42 }
 0x962   :  { %v533_v47 = vmul.f32 %v531_v46, %v529_v43 }
 0x9ce   :  { %v536_v44 = vpop.permute.xlu0 %535 }
 0x9cf   :  { %v538_v45 = vmul.f32 %v536_v44, %v529_v43 }
 0x9d1   :  { %540 = vrot.lane.b32.xlu1 %v538_v45, %s1451_s24 }
 0xa43   :  { %v541_v48 = vpop.permute.xlu1 %540 }
 0xa44   :  { %v543_v49 = vadd.f32 %v541_v48, %v533_v47 }
 0xa46   :  { %1394 = vtanh.f32 %v543_v49  ;;  %v641_v4 = vrot.slane %v543_v49, 7 }
 0xa50   :  { %v1395_v50 = vpop.eup %1394 }
 0xa51   :  { %546 = vrot.lane.b32.xlu0 %v1395_v50, %s1450_s0 }
 0xac3   :  { %v547_v51 = vpop.permute.xlu0 %546 }
 0xac4   :  { %v1565_v52 = vmul.f32 %v547_v51, %v529_v43 }
 0xac6   :  { %v556_v53 = vrot.slane %v1565_v52, 3 }
 0xac8   :  { %557 = vrot.lane.b32.xlu1 %v556_v53, %s1451_s24 }
 0xb3a   :  { %v558_v54 = vpop.permute.xlu1 %557 }
 0xb3b   :  { %1240 = vmatmul.mubr.msk.f32.vlgmr.msra.gmra.mrb[2].mxu0 %vm126_vm2, %v558_v54 }
 0xb3c   :  { %1348 = vmatpush3.bf16.msra.mxu0 %v1486_v12  ;;  %1261 = vmatprep.mubr.msk.f32.mxu0 %vm1448_vm0, %v1449_v1 }
 0xb3d   :  { %1349 = vmatprep.subr.bf16.mxu0 %v1447_v0 }
 0xb40   :  { %1351 = vmatpush3.bf16.msra.mxu0 %v1490_v18 }
 0xb41   :  { %1358 = vmatprep.subr.bf16.mxu0 %v1447_v0 }
 0xc0e   :  { %v627_v55 = vpop.f32.mrb[2].mxu0 }
 0xc0f   :  { %v632_v56 = vrot.slane %v627_v55, 4  ;;  %v1241_v57 = vpop.f32.mrb[3].mxu0 }
 0xc11   :  { %v634_v58 = vadd.f32 %v632_v56, %v1517_v37 }
 0xc13   :  { %1396 = vtanh.f32 %v634_v58  ;;  %v636_v60 = vmul.f32 0.5, %v634_v58 }
 0xc15   :  { %1398 = vtanh.f32 %v636_v60 }
 0xc1d   :  { %v1397_v59 = vpop.eup %1396 }
 0xc1e   :  { %645 = vrot.lane.b32.xlu0 %v1397_v59, %s1450_s0 }
 0xc1f   :  { %v1399_v61 = vpop.eup %1398 }
 0xc20   :  { %v638_v62 = vmul.f32 0.5, %v1399_v61 }
 0xc22   :  { %v639_v63 = vadd.f32 0.5, %v638_v62 }
 0xc24   :  { %v643_v5 = vmul.f32 %v641_v4, %v639_v63 }
 0xc90   :  { %v646_v2 = vpop.permute.xlu0 %645 }
 0xc91   :  { %v648_v3 = vmul.f32 %v646_v2, %v639_v63 }
 0xc93   :  { %650 = vrot.lane.b32.xlu1 %v648_v3, %s1451_s24 }
 0xd05   :  { %v651_v6 = vpop.permute.xlu1 %650 }
 0xd06   :  { %v653_v7 = vadd.f32 %v651_v6, %v643_v5 }
 0xd08   :  { %1400 = vtanh.f32 %v653_v7  ;;  %v751_v26 = vrot.slane %v653_v7, 7 }
 0xd12   :  { %v1401_v8 = vpop.eup %1400 }
 0xd13   :  { %656 = vrot.lane.b32.xlu0 %v1401_v8, %s1450_s0 }
 0xd85   :  { %v657_v10 = vpop.permute.xlu0 %656 }
 0xd86   :  { %v1580_v11 = vmul.f32 %v657_v10, %v639_v63 }
 0xd88   :  { %v666_v13 = vrot.slane %v1580_v11, 4 }
 0xd8a   :  { %667 = vrot.lane.b32.xlu1 %v666_v13, %s1451_s24 }
 0xdfc   :  { %v668_v14 = vpop.permute.xlu1 %667 }
 0xdfd   :  { %1251 = vmatmul.mubr.msk.f32.vlgmr.msra.gmra.mrb[8].mxu1 %vm126_vm2, %v668_v14 }
 0xdfe   :  { %1354 = vmatpush3.bf16.msra.mxu1 %v1486_v12  ;;  %1272 = vmatprep.mubr.msk.f32.mxu1 %vm1448_vm0, %v1449_v1 }
 0xdff   :  { %1355 = vmatprep.subr.bf16.mxu1 %v1447_v0 }
 0xe02   :  { %1357 = vmatpush3.bf16.msra.mxu1 %v1490_v18 }
 0xed0   :  { %v737_v15 = vpop.f32.mrb[8].mxu1 }
 0xed1   :  { %v742_v16 = vrot.slane %v737_v15, 3  ;;  %v1252_v17 = vpop.f32.mrb[9].mxu1 }
 0xed2   :  { %v49_v17 = vld [vmem:[#allocation3 + $0xc0] sm:$0xff] }
 0xed3   :  { %v744_v19 = vadd.f32 %v742_v16, %v1517_v37  ;;  %v48_v16 = vld [vmem:[#allocation3 + $0xb8] sm:$0xff] }
 0xed5   :  { %1402 = vtanh.f32 %v744_v19  ;;  %v746_v21 = vmul.f32 0.5, %v744_v19  ;;  %v1362_v19 = vpack.c.bf16 %v49_v17, %v48_v16 }
 0xed7   :  { %1404 = vtanh.f32 %v746_v21 }
 0xedf   :  { %v1403_v20 = vpop.eup %1402 }
 0xee0   :  { %755 = vrot.lane.b32.xlu0 %v1403_v20, %s1450_s0 }
 0xee1   :  { %v1405_v22 = vpop.eup %1404 }
 0xee2   :  { %v748_v12 = vmul.f32 0.5, %v1405_v22 }
 0xee4   :  { %v749_v23 = vadd.f32 0.5, %v748_v12 }
 0xee6   :  { %v753_v18 = vmul.f32 %v751_v26, %v749_v23 }
 0xf52   :  { %v756_v24 = vpop.permute.xlu0 %755 }
 0xf53   :  { %v758_v25 = vmul.f32 %v756_v24, %v749_v23 }
 0xf55   :  { %760 = vrot.lane.b32.xlu1 %v758_v25, %s1451_s24 }
 0xfc7   :  { %v761_v27 = vpop.permute.xlu1 %760 }
 0xfc8   :  { %v763_v28 = vadd.f32 %v761_v27, %v753_v18 }
 0xfca   :  { %1406 = vtanh.f32 %v763_v28  ;;  %v861_v47 = vrot.slane %v763_v28, 7 }
 0xfd4   :  { %v1407_v29 = vpop.eup %1406 }
 0xfd5   :  { %766 = vrot.lane.b32.xlu0 %v1407_v29, %s1450_s0 }
0x1047   :  { %v767_v30 = vpop.permute.xlu0 %766 }
0x1048   :  { %v769_v32 = vmul.f32 %v767_v30, %v749_v23 }
0x104a   :  { %v776_v33 = vrot.slane %v769_v32, 5 }
0x104c   :  { %777 = vrot.lane.b32.xlu1 %v776_v33, %s1451_s24 }
0x10be   :  { %v778_v34 = vpop.permute.xlu1 %777 }
0x10bf   :  { %1262 = vmatmul.mubr.msk.f32.vlgmr.msra.gmra.mrb[4].mxu0 %vm126_vm2, %v778_v34 }
0x10c0   :  { %1283 = vmatprep.mubr.msk.f32.mxu0 %vm1448_vm0, %v1449_v1 }
0x1192   :  { %v847_v35 = vpop.f32.mrb[4].mxu0 }
0x1193   :  { %v852_v36 = vrot.slane %v847_v35, 2  ;;  %v1263_v38 = vpop.f32.mrb[5].mxu0 }
0x1195   :  { %v854_v39 = vadd.f32 %v852_v36, %v1517_v37 }
0x1197   :  { %1408 = vtanh.f32 %v854_v39  ;;  %v856_v41 = vmul.f32 0.5, %v854_v39 }
0x1199   :  { %1410 = vtanh.f32 %v856_v41 }
0x11a1   :  { %v1409_v40 = vpop.eup %1408 }
0x11a2   :  { %865 = vrot.lane.b32.xlu0 %v1409_v40, %s1450_s0 }
0x11a3   :  { %v1411_v42 = vpop.eup %1410 }
0x11a4   :  { %v858_v43 = vmul.f32 0.5, %v1411_v42 }
0x11a6   :  { %v859_v44 = vadd.f32 0.5, %v858_v43 }
0x11a8   :  { %v863_v1 = vmul.f32 %v861_v47, %v859_v44 }
0x1214   :  { %v866_v45 = vpop.permute.xlu0 %865 }
0x1215   :  { %v868_v46 = vmul.f32 %v866_v45, %v859_v44 }
0x1217   :  { %870 = vrot.lane.b32.xlu1 %v868_v46, %s1451_s24 }
0x1289   :  { %v871_v48 = vpop.permute.xlu1 %870 }
0x128a   :  { %v873_v49 = vadd.f32 %v871_v48, %v863_v1 }
0x128c   :  { %1412 = vtanh.f32 %v873_v49 }
0x1296   :  { %v1413_v50 = vpop.eup %1412 }
0x1297   :  { %876 = vrot.lane.b32.xlu0 %v1413_v50, %s1450_s0 }
0x1309   :  { %v877_v51 = vpop.permute.xlu0 %876 }
0x130a   :  { %v879_v53 = vmul.f32 %v877_v51, %v859_v44 }
0x130c   :  { %v886_v54 = vrot.slane %v879_v53, 6 }
0x130e   :  { %887 = vrot.lane.b32.xlu1 %v886_v54, %s1451_s24 }
0x1380   :  { %v888_v55 = vpop.permute.xlu1 %887 }
0x1381   :  { %1273 = vmatmul.mubr.msk.f32.vlgmr.msra.gmra.mrb[10].mxu1 %vm126_vm2, %v888_v55 }
0x1454   :  { %v957_v56 = vpop.f32.mrb[10].mxu1 }
0x1455   :  { %v962_v57 = vrot.slane %v957_v56, 1  ;;  %v1274_v58 = vpop.f32.mrb[11].mxu1 }
0x1457   :  { %v964_v59 = vadd.f32 %v962_v57, %v1517_v37  ;;  %v971_v37 = vrot.slane %v873_v49, 7 }
0x1459   :  { %1414 = vtanh.f32 %v964_v59  ;;  %v966_v61 = vmul.f32 0.5, %v964_v59 }
0x145b   :  { %1416 = vtanh.f32 %v966_v61 }
0x1463   :  { %v1415_v60 = vpop.eup %1414 }
0x1464   :  { %975 = vrot.lane.b32.xlu0 %v1415_v60, %s1450_s0 }
0x1465   :  { %v1417_v62 = vpop.eup %1416 }
0x1466   :  { %v968_v63 = vmul.f32 0.5, %v1417_v62 }
0x1468   :  { %v969_v2 = vadd.f32 0.5, %v968_v63 }
0x146a   :  { %v973_v5 = vmul.f32 %v971_v37, %v969_v2 }
0x14d6   :  { %v976_v3 = vpop.permute.xlu0 %975 }
0x14d7   :  { %v978_v4 = vmul.f32 %v976_v3, %v969_v2 }
0x14d9   :  { %980 = vrot.lane.b32.xlu1 %v978_v4, %s1451_s24 }
0x14dd   :  { %331 = vrot.lane.b32.xlu1 %v1535_v9, %s1451_s24  ;;  %v46_v9 = vld [vmem:[#allocation3 + $0xa8] sm:$0xff] }
0x14e1   :  { %551 = vrot.lane.b32.xlu1 %v1565_v52, %s1451_s24  ;;  %v47_v52 = vld [vmem:[#allocation3 + $0xb0] sm:$0xff] }
0x14e2   :  { %v1359_v15 = vpack.c.bf16 %v47_v52, %v46_v9 }
0x14e4   :  { %1360 = vmatpush3.bf16.msra.mxu0 %v1359_v15 }
0x14e5   :  { %771 = vrot.lane.b32.xlu1 %v769_v32, %s1451_s24  ;;  %1361 = vmatprep.subr.bf16.mxu0 %v1447_v0  ;;  %v1088_v0 = vld [vmem:[#allocation3 + $0xc8] ss:$0 sm:$0xff] }
0x14e8   :  { %1363 = vmatpush3.bf16.msra.mxu0 %v1362_v19 }
0x154b   :  { %v981_v6 = vpop.permute.xlu1 %980 }
0x154c   :  { %v983_v7 = vadd.f32 %v981_v6, %v973_v5 }
0x154e   :  { %1418 = vtanh.f32 %v983_v7 }
0x154f   :  { %v332_v8 = vpop.permute.xlu1 %331 }
0x1550   :  { %335 = vst.msk [vmem:[#allocation2] sm:$0x2] %vm334_vm3, %v332_v8 }
0x1553   :  { %v552_v10 = vpop.permute.xlu1 %551 }
0x1554   :  { %555 = vst.msk [vmem:[#allocation2] sm:$0x8] %vm554_vm4, %v552_v10 }
0x1557   :  { %v772_v13 = vpop.permute.xlu1 %771 }
0x1558   :  { %v1419_v14 = vpop.eup %1418  ;;  %775 = vst.msk [vmem:[#allocation2] sm:$0x20] %vm774_vm5, %v772_v13 }
0x1559   :  { %986 = vrot.lane.b32.xlu0 %v1419_v14, %s1450_s0 }
0x155d   :  { %441 = vrot.lane.b32.xlu0 %v1550_v31, %s1451_s24 }
0x1561   :  { %661 = vrot.lane.b32.xlu0 %v1580_v11, %s1451_s24 }
0x1565   :  { %881 = vrot.lane.b32.xlu0 %v879_v53, %s1451_s24 }
0x15cb   :  { %v987_v20 = vpop.permute.xlu0 %986 }
0x15cc   :  { %v989_v21 = vmul.f32 %v987_v20, %v969_v2 }
0x15ce   :  { %991 = vrot.lane.b32.xlu1 %v989_v21, %s1451_s24 }
0x15cf   :  { %v442_v31 = vpop.permute.xlu0 %441 }
0x15d0   :  { %445 = vst.msk [vmem:[#allocation2] sm:$0x4] %vm444_vm6, %v442_v31 }
0x15d3   :  { %v662_v11 = vpop.permute.xlu0 %661 }
0x15d4   :  { %665 = vst.msk [vmem:[#allocation2] sm:$0x10] %vm664_vm7, %v662_v11 }
0x15d7   :  { %v882_v22 = vpop.permute.xlu0 %881 }
0x15d8   :  { %885 = vst.msk [vmem:[#allocation2] sm:$0x40] %vm884_vm8, %v882_v22 }
0x1640   :  { %v992_v12 = vpop.permute.xlu1 %991 }
0x1641   :  { %995 = vst.msk [vmem:[#allocation2] sm:$0x80] %vm994_vm9, %v992_v12 }
0x1648   :  { %v996_v23 = vld [vmem:[#allocation2] sm:$0xff] }
0x1649   :  { %1284 = vmatmul.mubr.msk.f32.vlgmr.msra.gmra.mrb[6].mxu0 %vm126_vm2, %v996_v23 }
0x171c   :  { %v1070_v24 = vpop.f32.mrb[6].mxu0 }
0x171d   :  { %v1071_v25 = vadd.f32 %v1088_v0, %v1070_v24  ;;  %v1285_v26 = vpop.f32.mrb[7].mxu0 }
0x171f   :  { %1074 = vst [vmem:[%s1626_s2] sm:$0xff] %v1071_v25 }
0x1720   :  { %1079 = vsyncpa [#allocation4], 1 }

</bundles_post_ra>
